<compile_context>
chip_gen: v7x
topology: tpu7x:2x2x1
jax: 0.10.0
libtpu: 0.0.40
codegen_flags: <defaults>
</compile_context>

<pallas_src>
from functools import lru_cache

import numpy as np
import jax
import jax.numpy as jnp
from jax.experimental import pallas as pl
from jax.experimental.pallas import tpu as pltpu


# ------------------------------ pe table ------------------------------------

def pe_tensor(d_model: int, max_len: int, base: float) -> jnp.ndarray:
    """Deterministic sinusoidal positional-encoding table (same math as torch ref)."""
    position = np.arange(0, max_len, dtype=np.float32)[:, None]               # (max_len, 1)
    div_term = np.exp(np.arange(0, d_model, 2, dtype=np.float32)
                      * (-np.log(base) / d_model))                             # (ceil(d/2),)
    pe = np.zeros((max_len, d_model), dtype=np.float32)
    pe[:, 0::2] = np.sin(position * div_term)
    pe[:, 1::2] = np.cos(position * div_term[: pe[:, 1::2].shape[1]])
    return jnp.asarray(pe)


# ------------------------------- kernel -------------------------------------

def _add_pe_kernel(x_ref, pe_ref, o_ref):
    # Works for every tiling used below:
    #   flat : x (tile_b, tile)        + pe (1, tile)
    #   seq  : x (tile_b, seq_tile, D) + pe (seq_tile, D)
    #   small: x (1, seq_len, D)       + pe (seq_len, D)
    o_ref[...] = x_ref[...] + pe_ref[...]


# ------------------------------ helpers -------------------------------------

def _floor_multiple(n: int, m: int) -> int:
    return (n // m) * m


def _largest_aligned_divisor(n: int, align: int, cap: int) -> int:
    """Largest d with d % align == 0, d | n, d <= cap.  0 if none (all Python ints)."""
    if n <= 0 or cap < align or n % align != 0:
        return 0
    d = _floor_multiple(min(n, cap), align)
    while d >= align:
        if n % d == 0:
            return d
        d -= align
    return 0


@lru_cache(maxsize=None)
def _hw_budgets():
    """(per-block byte cap, scoped-VMEM limit), tuned per TPU generation."""
    vmem_cap = 64 << 20            # conservative default = v7x physical VMEM per TC
    try:
        info = pltpu.get_tpu_info()
        vmem_cap = int(getattr(info, "vmem_capacity_bytes", vmem_cap))
    except Exception:
        pass
    # Block cap: v7x (64 MiB)  -> ~5.3 MiB blocks; v5e/v6e (128 MiB) -> 8 MiB blocks.
    # Double-buffered x + out (+ small pe) stays ~4.5x block, well under the limit.
    block_cap = int(min(8 << 20, max(2 << 20, vmem_cap // 12)))
    # Scoped-VMEM limit: ~75% of physical, capped at 64 MiB (v7x -> 48 MiB).
    vmem_limit = int(min(64 << 20, (vmem_cap * 3) // 4))
    return block_cap, vmem_limit


def _forward_small(x, pe2d, seq_len, offset, vmem_limit):
    """Tiny shapes (seq_len*D < 128): single full-array blocks (block == array dims)."""
    B, S, D = x.shape
    x_sliced = x[:, offset:, :]                   # (B, seq_len, D); no-op when offset == 0
    pe_sliced = pe2d[:seq_len, :]
    return pl.pallas_call(
        _add_pe_kernel,
        out_shape=jax.ShapeDtypeStruct((B, seq_len, D), x.dtype),
        grid_spec=pltpu.PrefetchScalarGridSpec(
            num_scalar_prefetch=0,
            grid=(B,),
            in_specs=[
                pl.BlockSpec((1, seq_len, D), lambda b: (b, 0, 0)),
                pl.BlockSpec((seq_len, D), lambda b: (0, 0)),
            ],
            out_specs=pl.BlockSpec((1, seq_len, D), lambda b: (b, 0, 0)),
        ),
        compiler_params=pltpu.CompilerParams(
            dimension_semantics=("parallel",), vmem_limit_bytes=vmem_limit),
    )(x_sliced, pe_sliced)


# ------------------------------- forward ------------------------------------

def positional_encoding_forward(x: jnp.ndarray, pe_flat: jnp.ndarray, max_len: int) -> jnp.ndarray:
    """Equivalent of PositionalEncoding.forward.

    x:       (B, S, D)
    pe_flat: (1, max_len*D), already in x.dtype (pre-cast at init)
    returns  (B, min(S, max_len), D) = x[:, -seq_len:] + pe[:seq_len]
    """
    B, S, D = x.shape
    seq_len = min(max_len, S)
    offset = S - seq_len                      # timesteps dropped from the front of x
    L = seq_len * D                           # flattened output row length
    off_flat = offset * D                     # flattened element offset into x rows

    assert pe_flat.shape == (1, max_len * D)
    if pe_flat.dtype != x.dtype:
        # Prefer pre-casting at init (this line costs one extra XLA pass over pe).
        pe_flat = pe_flat.astype(x.dtype)

    block_cap_bytes, vmem_limit = _hw_budgets()
    itemsize = x.dtype.itemsize

    # dtype-aware sublane tile: 8 rows (f32) / 16 (bf16) / 32 (int8/fp8) per packed vreg.
    rows_per_vreg = max(8, 8 * (4 // max(1, itemsize)))
    tile_b = B if B <= rows_per_vreg else rows_per_vreg
    num_b_tiles = -(-B // tile_b)

    # Tiny rows: full-array blocks sidestep the (8,128) tiling rules entirely.
    if L < 128:
        return _forward_small(x, pe_flat.reshape(max_len, D), seq_len, offset, vmem_limit)

    # Largest lane-dense (multiple-of-128) flattened tile within the per-block budget.
    max_tile_elems = max(128, _floor_multiple(block_cap_bytes // (tile_b * itemsize), 128))
    ideal_tile = min(max_tile_elems, _floor_multiple(L, 128))

    def run_flat(x2d, off_blocks, tile):
        num_tiles = -(-L // tile)                      # ragged last block allowed
        out = pl.pallas_call(
            _add_pe_kernel,
            out_shape=jax.ShapeDtypeStruct((B, L), x.dtype),
            grid_spec=pltpu.PrefetchScalarGridSpec(
                num_scalar_prefetch=0,
                # Batch innermost: pe block index constant across consecutive steps,
                # so Pallas skips its re-DMA while batch sweeps.
                grid=(num_tiles, num_b_tiles),
                in_specs=[
                    # Optionally sweep pipeline_mode=pl.Buffered(3) here if a trace
                    # still shows exposed DMA; bigger blocks are preferred on v7x.
                    pl.BlockSpec((tile_b, tile), lambda t, b: (b, off_blocks + t)),
                    pl.BlockSpec((1, tile), lambda t, b: (0, t)),
                ],
                out_specs=pl.BlockSpec((tile_b, tile), lambda t, b: (b, t)),
            ),
            compiler_params=pltpu.CompilerParams(
                dimension_semantics=("parallel", "parallel"),
                vmem_limit_bytes=vmem_limit,
            ),
        )(x2d, pe_flat)
        return out.reshape(B, seq_len, D)

    def run_seq(seq_tile):
        # 3-D path: offset folded into the seq block index (requires offset % seq_tile == 0).
        off_seq_blocks = offset // seq_tile
        num_s_tiles = -(-seq_len // seq_tile)
        pe2d = pe_flat.reshape(max_len, D)
        return pl.pallas_call(
            _add_pe_kernel,
            out_shape=jax.ShapeDtypeStruct((B, seq_len, D), x.dtype),
            grid_spec=pltpu.PrefetchScalarGridSpec(
                num_scalar_prefetch=0,
                grid=(num_s_tiles, num_b_tiles),
                in_specs=[
                    pl.BlockSpec((tile_b, seq_tile, D), lambda t, b: (b, off_seq_blocks + t, 0)),
                    pl.BlockSpec((seq_tile, D), lambda t, b: (t, 0)),
                ],
                out_specs=pl.BlockSpec((tile_b, seq_tile, D), lambda t, b: (b, t, 0)),
            ),
            compiler_params=pltpu.CompilerParams(
                dimension_semantics=("parallel", "parallel"),
                vmem_limit_bytes=vmem_limit,
            ),
        )(x, pe2d)

    if offset == 0:
        return run_flat(x.reshape(B, S * D), 0, ideal_tile)

    # offset > 0: avoid an extra HBM pass by folding the "last seq_len steps" slice
    # into the index_map — either on the flattened axis (needs tile | off_flat) or on
    # the seq axis (needs seq_tile | offset, seq_tile multiple of 8).
    t_fused = _largest_aligned_divisor(off_flat, 128, ideal_tile)

    seq_tile = 0
    cap_seq = min(max(1, max_tile_elems // D), _floor_multiple(seq_len, 8))
    if offset % 8 == 0 and cap_seq >= 8:
        seq_tile = _largest_aligned_divisor(offset, 8, cap_seq)
    t_seq = seq_tile * D

    # Accept a fused path only if its block is within ~8x of the ideal block size;
    # otherwise per-step (~0.35us) overhead of many tiny blocks would cost more than
    # one extra slice pass over x.
    if max(t_fused, t_seq) * 8 >= ideal_tile:
        if t_fused >= t_seq:
            return run_flat(x.reshape(B, S * D), off_flat // t_fused, t_fused)
        return run_seq(seq_tile)

    # TODO(synk): replace this wrapper-side slice (one extra HBM pass over x) with a
    # manual double-buffered pltpu.make_async_copy path (memory_space=pl.ANY, pl.ds
    # with pl.multiple_of) for offsets that are not block-alignable at all.
    x_sliced = x[:, offset:, :].reshape(B, L)
    return run_flat(x_sliced, 0, ideal_tile)


# ------------------------------ module wrapper ------------------------------

class PositionalEncoding:
    """Pallas-TPU equivalent of the torch PositionalEncoding module.

    The sinusoidal table is pre-cast to the activation dtype and pre-flattened at
    init so the per-call path does no extra XLA passes over pe.
    """

    def __init__(self, d_model: int, max_len: int, base: float, dtype=jnp.float32):
        self.d_model = d_model
        self.max_len = max_len
        self.pe = pe_tensor(d_model, max_len, base)                                  # (max_len, D) f32
        self.pe_flat = self.pe.astype(dtype).reshape(1, max_len * d_model)            # hoisted cast

    def __call__(self, x: jnp.ndarray) -> jnp.ndarray:
        assert x.shape[-1] == self.d_model
        return positional_encoding_forward(x, self.pe_flat, self.max_len)


# --------------------------------- demo -------------------------------------

if __name__ == "__main__":
    BASE = 10000.0

    def reference(x, pe, max_len):
        seq_len = min(max_len, x.shape[1])
        return x[:, x.shape[1] - seq_len:, :] + pe[:seq_len, :]

    def check(d_model, max_len, batch, seq):
        enc = PositionalEncoding(d_model, max_len, BASE, dtype=jnp.float32)
        x = jax.random.normal(jax.random.PRNGKey(0), (batch, seq, d_model), dtype=jnp.float32)
        out = jax.block_until_ready(enc(x))
        ref = reference(x, enc.pe, max_len)
        assert out.shape == ref.shape, (out.shape, ref.shape)
        np.testing.assert_allclose(np.asarray(out), np.asarray(ref), rtol=1e-6, atol=1e-6)

    # (1) S <= max_len (offset == 0): lane-dense flat path.
    check(d_model=32, max_len=16, batch=2, seq=8)
    # (2) S > max_len, 128-aligned flattened offset: fused flat path (no extra pass).
    check(d_model=32, max_len=16, batch=2, seq=24)
    # (3) S > max_len, awkward D, 8-aligned offset: 3-D seq-tiled path.
    check(d_model=24, max_len=16, batch=2, seq=24)
    # (4) unaligned offset: wrapper-slice fallback path.
    check(d_model=40, max_len=16, batch=2, seq=19)
    # (5) tiny rows (< 128 flattened elems): full-block path.
    check(d_model=8, max_len=16, batch=2, seq=3)

    print("KERNEL_OK")
</pallas_src>

<mosaic_0001>
module attributes {stable_mosaic.version = 11 : i64} {
  func.func @_add_pe_kernel(%arg0: i32, %arg1: i32, %arg2: memref<2x256xf32, #tpu.memory_space<vmem>>, %arg3: memref<1x256xf32, #tpu.memory_space<vmem>>, %arg4: memref<2x256xf32, #tpu.memory_space<vmem>>) attributes {dimension_semantics = [#tpu.dimension_semantics<parallel>, #tpu.dimension_semantics<parallel>], iteration_bounds = array<i64: 1, 1>, scalar_prefetch = 0 : i64, scratch_operands = 0 : i64, tpu.core_type = #tpu.core_type<tc>, window_params = [{transform_indices = @transform_0, window_bounds = array<i64: 2, 256>}, {transform_indices = @transform_1, window_bounds = array<i64: 1, 256>}, {transform_indices = @transform_2, window_bounds = array<i64: 2, 256>}]} {
    %c0 = arith.constant 0 : index
    %c0_0 = arith.constant 0 : index
    %0 = vector.load %arg2[%c0, %c0_0] : memref<2x256xf32, #tpu.memory_space<vmem>>, vector<2x256xf32>
    %c0_1 = arith.constant 0 : index
    %c0_2 = arith.constant 0 : index
    %1 = vector.load %arg3[%c0_1, %c0_2] : memref<1x256xf32, #tpu.memory_space<vmem>>, vector<1x256xf32>
    %2 = vector.broadcast %1 : vector<1x256xf32> to vector<2x256xf32>
    %3 = arith.addf %0, %2 : vector<2x256xf32>
    %c0_3 = arith.constant 0 : index
    %c0_4 = arith.constant 0 : index
    %4 = vector.load %arg4[%c0_3, %c0_4] : memref<2x256xf32, #tpu.memory_space<vmem>>, vector<2x256xf32>
    tpu.vector_store %arg4[%c0_3, %c0_4], %3 {strides = array<i32>} : memref<2x256xf32, #tpu.memory_space<vmem>>, vector<2x256xf32>,
    return
  }
  func.func @transform_0(%arg0: i32, %arg1: i32) -> (i32, i32) {
    %c0_i32 = arith.constant 0 : i32
    %0 = arith.addi %c0_i32, %arg0 : i32
    %c0_i32_0 = arith.constant 0 : i32
    return %arg1, %0 : i32, i32
  }
  func.func @transform_1(%arg0: i32, %arg1: i32) -> (i32, i32) {
    %c0_i32 = arith.constant 0 : i32
    %c0_i32_0 = arith.constant 0 : i32
    return %c0_i32, %arg0 : i32, i32
  }
  func.func @transform_2(%arg0: i32, %arg1: i32) -> (i32, i32) {
    %c0_i32 = arith.constant 0 : i32
    return %arg1, %arg0 : i32, i32
  }
}

</mosaic_0001>

<bundles_post_ra>
// kernel: tpu_custom_call.1
= control target key start
LH: loop header
LB: loop body
LE: loop exit
PB: predicated region body
PF: predicated region fallthrough
CT: control target
= control target key end

     0   :  { %7 = vsyncpa [#allocation3], 0  ;;  %s215_s0 = inlined_call_operand.hbm [shape: f32[2,256], index: 0, kind: input, shape index: {}]   ;;  %s216_s1 = inlined_call_operand.hbm [shape: f32[1,512], index: 1, kind: input, shape index: {}]   ;;  %s217_s2 = inlined_call_operand.hbm [shape: f32[2,256], index: 2, kind: output, shape index: {}]  }
   0x1   :  { %8 = vsyncpa [#allocation6], 0 }
   0x2   :  { %9 = vsyncpa [#allocation4], 0  ;;  %s150_s9 = smov [#allocation2]   ;;  %s151_s11 = smov [#allocation5]  }
   0x3   :  { %s16_s10 = sshll.u32 %s150_s9, 4  ;;  %s26_s12 = sshll.u32 %s151_s11, 4  ;;  %s17_s10 = int_to_ptr.vmem [resolvable:$true] %s16_s10  ;;  %s169_s12 = int_to_ptr.vmem [resolvable:$true] %s26_s12 }
   0x4   :  { %s78_s15 = scalar_lea.hbm %s215_s0, 64 }
   0x5   :  { %p79_p0 = scmp.ne.s32.totalorder %s215_s0, %s78_s15  ;;  %p82_p1 = scmp.lt.u32.totalorder %s78_s15, %s215_s0 }
   0x7   :  { %p84_p2 = pnand %p82_p1, %p79_p0 }
   0x9   :  { %87 = shalt.err (!%p84_p2)
}
   0xa   :  { %s88_s20 = scalar_lea.vmem %s17_s10, 64  ;;  %p93_p4 = scmp.lt.s32.totalorder %s17_s10, %s17_s10 }
   0xb   :  { %p89_p3 = scmp.ne.s32.totalorder %s17_s10, %s88_s20  ;;  %p94_p5 = scmp.lt.s32.totalorder %s88_s20, %s88_s20 }
   0xd   :  { %p95_p6 = por %p94_p5, %p93_p4 }
   0xf   :  { %p96_p7 = pnand %p95_p6, %p89_p3 }
  0x11   :  { %99 = shalt.err (!%p96_p7)
}
  0x12   :  { %19 = dma.hbm_to_vmem [thread:$0]  %s215_s0, 64, %s17_s10, [#allocation3]  }
  0x13   :  { %s100_s25 = scalar_lea.hbm %s216_s1, 32  ;;  %s102_s30 = scalar_lea.hbm %s216_s1, 64 }
  0x14   :  { %p101_p8 = scmp.ne.s32.totalorder %s216_s1, %s100_s25  ;;  %p103_p9 = scmp.lt.u32.totalorder %s102_s30, %s100_s25 }
  0x15   :  { %p104_p10 = scmp.lt.u32.totalorder %s100_s25, %s216_s1 }
  0x17   :  { %p105_p11 = por %p104_p10, %p103_p9 }
  0x19   :  { %p106_p12 = pnand %p105_p11, %p101_p8 }
  0x1b   :  { %109 = shalt.err (!%p106_p12)
}
  0x1c   :  { %s110_s0 = scalar_lea.vmem %s169_s12, 32  ;;  %p115_p0 = scmp.lt.s32.totalorder %s169_s12, %s169_s12 }
  0x1d   :  { %p111_p13 = scmp.ne.s32.totalorder %s169_s12, %s110_s0  ;;  %p116_p1 = scmp.lt.s32.totalorder %s110_s0, %s110_s0 }
  0x1f   :  { %p117_p2 = por %p116_p1, %p115_p0 }
  0x21   :  { %p118_p3 = pnand %p117_p2, %p111_p13 }
  0x23   :  { %121 = shalt.err (!%p118_p3)
}
  0x24   :  { %29 = dma.hbm_to_vmem [thread:$0]  %s216_s1, 32, %s169_s12, [#allocation6]  }
  0x25   :  { %144 = dma.done.wait [#allocation3], 64  }
  0x26   :  { %145 = vsyncadd [#allocation3], 4294967232 }
  0x27   :  { %146 = dma.done.wait [#allocation6], 32  }
  0x28   :  { %147 = vsyncadd [#allocation6], 4294967264  ;;  %v39_v0 = vlaneseq  ;;  %v152_v1 = vmov 1983009808   ;;  %v37_v7 = vld [vmem:[#allocation5] sm:$0x3] }
  0x29   :  { %v49_v2 = vunpack.c.l.s4 %v152_v1  ;;  %v36_v12 = vld [vmem:[#allocation2] sm:$0xf]  ;;  %s153_s7 = smov [#allocation7]  }
  0x2a   :  { %v40_v3 = vshrl.u32 %v39_v0, 7  ;;  %s64_s8 = sshll.u32 %s153_s7, 4  ;;  %s65_s8 = int_to_ptr.vmem [resolvable:$true] %s64_s8 }
  0x2b   :  { %v50_v6 = vunpack.c.0.s8 %v49_v2  ;;  %s122_s1 = scalar_lea.vmem %s65_s8, 64  ;;  %p127_p5 = scmp.lt.s32.totalorder %s65_s8, %s65_s8 }
  0x2c   :  { %v41_v4 = vsub.s32 0, %v40_v3  ;;  %v45_v5 = vsub.s32 1, %v40_v3  ;;  %p123_p4 = scmp.ne.s32.totalorder %s65_s8, %s122_s1  ;;  %p128_p6 = scmp.lt.s32.totalorder %s122_s1, %s122_s1 }
  0x2d   :  { %v53_v10 = vsub.s32 %v50_v6, %v40_v3 }
  0x2e   :  { %v42_v8 = vrot.slane %v37_v7, %v41_v4  ;;  %v46_v9 = vrot.slane %v37_v7, %v45_v5  ;;  %p129_p7 = por %p128_p6, %p127_p5 }
  0x30   :  { %v47_v11 = vcombine.low %v42_v8, %v46_v9  ;;  %p130_p8 = pnand %p129_p7, %p123_p4 }
  0x32   :  { %v54_v13 = vrot.slane %v47_v11, %v53_v10 }
  0x34   :  { %v56_v14 = vadd.f32 %v54_v13, %v36_v12 }
  0x36   :  { %57 = vst [vmem:[#allocation7] sm:$0xf] %v56_v14 }
  0x37   :  { %133 = shalt.err (!%p130_p8)
}
  0x38   :  { %s134_s11 = scalar_lea.hbm %s217_s2, 64 }
  0x39   :  { %p135_p9 = scmp.ne.s32.totalorder %s217_s2, %s134_s11  ;;  %p138_p10 = scmp.lt.u32.totalorder %s134_s11, %s217_s2 }
  0x3b   :  { %p140_p11 = pnand %p138_p10, %p135_p9 }
  0x3d   :  { %143 = shalt.err (!%p140_p11)
}
  0x3e   :  { %67 = dma.vmem_to_hbm [thread:$0]  %s65_s8, 64, %s217_s2, [#allocation4]  }
  0x3f   :  { %148 = dma.done.wait [#allocation4], 64  }
  0x40   :  { %149 = vsyncadd [#allocation4], 4294967232 }
  0x41   :  { %71 = vsyncpa [#allocation3], 1 }
  0x42   :  { %72 = vsyncpa [#allocation6], 1 }
  0x43   :  { %73 = vsyncpa [#allocation4], 1 }

</bundles_post_ra>
